<compile_context>
chip_gen: v7x
topology: tpu7x:2x2x1
jax: 0.10.0
libtpu: 0.0.40
codegen_flags: <defaults>
</compile_context>

<pallas_src>
import jax
import jax.numpy as jnp
from jax.experimental import pallas as pl
from jax.experimental.pallas import tpu as pltpu

_HIGHEST = jax.lax.Precision.HIGHEST
_LANE = 128


# ----------------------------------------------------------------------------
# Kernel: fused affine map, batch-tiled (parallel) x feature-tiled (arbitrary).
# ----------------------------------------------------------------------------
def affine_kernel(x_ref, w_ref, b_ref, o_ref, acc_ref):
    # x_ref:  (TB, TK) VMEM    w_ref: (1, TK) VMEM    b_ref: (1, 1) SMEM
    # o_ref:  (1, TB)  VMEM    acc_ref: (1, TB) f32 VMEM scratch
    k = pl.program_id(1)

    @pl.when(k == 0)
    def _():
        acc_ref[...] = jnp.zeros_like(acc_ref)

    # Contract the feature dim of both operands -> (1, TB): batch lands on the
    # lane axis so the final store is lane-dense (no masked vst.msk).
    acc_ref[...] += jax.lax.dot_general(
        w_ref[...], x_ref[...],
        dimension_numbers=(((1,), (1,)), ((), ())),
        preferred_element_type=jnp.float32,
        precision=_HIGHEST,
    )

    @pl.when(k == pl.num_programs(1) - 1)
    def _():
        o_ref[...] = (acc_ref[...] + b_ref[0, 0]).astype(o_ref.dtype)


# ----------------------------------------------------------------------------
# Parameter folding (done ONCE, outside the per-call path, in plain JAX).
# ----------------------------------------------------------------------------
def fold_affine(params):
    """Collapse the Linear/Dropout(eval) chain into (w_row (1, D), b_eff (1, 1))."""
    w_eff, b_eff = params[0]
    for w, b in params[1:]:
        w_eff = jnp.dot(w_eff, w, precision=_HIGHEST)
        b_eff = jnp.dot(b_eff, w, precision=_HIGHEST) + b
    return w_eff.T, b_eff  # (1, D), (1, 1)


# ----------------------------------------------------------------------------
# Tile / VMEM budgeting.
# ----------------------------------------------------------------------------
def _vmem_budget():
    """Generation-aware (vmem_limit_bytes, per-x-buffer byte cap)."""
    try:
        cap = pltpu.get_tpu_info().vmem_capacity_bytes
    except Exception:
        cap = None
    if not cap:
        cap = 64 << 20                       # conservative: assume v7x-sized VMEM
    vmem_limit = min(64 << 20, (cap * 3) // 4)   # 48 MiB on v7x, 64 MiB on v5e/v6e
    per_buf_cap = min(8 << 20, (vmem_limit - (4 << 20)) // 2)
    return vmem_limit, per_buf_cap


def _choose_k_tile(d, itemsize, per_buf_cap):
    # Keep the full feature dim unless even a 128-row tile with full D would
    # blow the per-buffer budget AND D is 128-aligned (only then can we tile K).
    if d % _LANE != 0 or _LANE * d * itemsize <= per_buf_cap:
        return d
    n = d // _LANE
    best = 1
    for c in range(1, n + 1):
        if n % c == 0 and _LANE * (c * _LANE) * itemsize <= per_buf_cap:
            best = c
    return best * _LANE


def _choose_batch_tile(b_pad, k_tile, itemsize, per_buf_cap, min_steps):
    for t in (8192, 4096, 2048, 1024, 512, 256, 128):
        if t > b_pad or b_pad % t:
            continue
        if b_pad // t < min_steps:           # keep >=2 steps for v7x megacore
            continue
        if t * k_tile * itemsize <= per_buf_cap:
            return t
    return _LANE


# ----------------------------------------------------------------------------
# Forward on pre-folded parameters.
# ----------------------------------------------------------------------------
def _mlp_forward_folded(x, w_row, b_eff, *, batch_tile=None):
    """x: (B, D) f32; w_row: (1, D); b_eff: (1, 1)."""
    B, D = x.shape
    itemsize = jnp.dtype(x.dtype).itemsize

    # Pad batch to a multiple of 128: lane/sublane aligned tiles + multi-step grid.
    b_pad = ((B + _LANE - 1) // _LANE) * _LANE
    if b_pad != B:
        x = jnp.pad(x, ((0, b_pad - B), (0, 0)))

    vmem_limit, per_buf_cap = _vmem_budget()
    k_tile = _choose_k_tile(D, itemsize, per_buf_cap)
    if batch_tile is None:
        min_steps = 2 if b_pad >= 2 * _LANE else 1
        batch_tile = _choose_batch_tile(b_pad, k_tile, itemsize, per_buf_cap, min_steps)
    assert b_pad % batch_tile == 0 and D % k_tile == 0

    # Make sure the scoped limit covers what we actually double-buffer.
    vmem_limit = max(
        vmem_limit,
        2 * (batch_tile * k_tile + k_tile + batch_tile) * itemsize + (4 << 20),
    )

    nb, nk = b_pad // batch_tile, D // k_tile

    out = pl.pallas_call(
        affine_kernel,
        out_shape=jax.ShapeDtypeStruct((1, b_pad), jnp.float32),
        grid_spec=pltpu.PrefetchScalarGridSpec(
            num_scalar_prefetch=0,
            grid=(nb, nk),                                   # reduction axis last
            in_specs=[
                pl.BlockSpec((batch_tile, k_tile), lambda i, k: (i, k)),  # x tile
                pl.BlockSpec((1, k_tile), lambda i, k: (0, k)),           # folded W row
                pl.BlockSpec(memory_space=pltpu.MemorySpace.SMEM),        # folded bias
            ],
            out_specs=pl.BlockSpec((1, batch_tile), lambda i, k: (0, i)),
            scratch_shapes=[pltpu.VMEM((1, batch_tile), jnp.float32)],
        ),
        compiler_params=pltpu.CompilerParams(
            dimension_semantics=("parallel", "arbitrary"),
            vmem_limit_bytes=int(vmem_limit),
        ),
    )(x, w_row, b_eff)

    return out.reshape(b_pad, 1)[:B]


def make_mlp(params, *, batch_tile=None):
    """Fold the weight chain ONCE and return a jitted forward(x) -> (B, 1)."""
    w_row, b_eff = fold_affine(params)        # done once, at "weight-load" time
    w_row = jax.device_put(w_row)
    b_eff = jax.device_put(b_eff)

    @jax.jit
    def forward(x):
        return _mlp_forward_folded(x, w_row, b_eff, batch_tile=batch_tile)

    return forward


# ----------------------------------------------------------------------------
# Deterministic init mimicking nn.Linear (uniform +/- 1/sqrt(fan_in)),
# weights stored as (in, out) so forward is x @ W + b.
# ----------------------------------------------------------------------------
def init_linear(key, fan_in, fan_out):
    kw, kb = jax.random.split(key)
    bound = 1.0 / jnp.sqrt(float(fan_in))
    w = jax.random.uniform(kw, (fan_in, fan_out), jnp.float32, -bound, bound)
    b = jax.random.uniform(kb, (1, fan_out), jnp.float32, -bound, bound)
    return w, b


def make_params(key, input_size):
    dims = [input_size, 1024, 128, 64, 16, 1]
    keys = jax.random.split(key, len(dims) - 1)
    return [init_linear(k, dims[i], dims[i + 1]) for i, k in enumerate(keys)]


def mlp_reference(x, params):
    # Layer-by-layer reference (Dropout == identity in eval mode).
    h = x
    for w, b in params:
        h = jnp.dot(h, w, precision=_HIGHEST) + b
    return h


if __name__ == "__main__":
    key = jax.random.PRNGKey(0)
    k_x, k_p, k_x2, k_x3 = jax.random.split(key, 4)

    # Small shapes consistent with the module.
    batch, input_size = 8, 128
    x = jax.random.normal(k_x, (batch, input_size), jnp.float32)
    params = make_params(k_p, input_size)
    mlp = make_mlp(params)                      # weight chain folded once here
    out = jax.block_until_ready(mlp(x))
    ref = mlp_reference(x, params)
    assert out.shape == (batch, 1)
    assert jnp.allclose(out, ref, atol=1e-3, rtol=1e-3), float(
        jnp.max(jnp.abs(out - ref)))

    # Multi-step tiled grid (>= 2 "parallel" batch steps, both TCs busy on v7x).
    batch2, input_size2 = 1024, 256
    params2 = make_params(k_p, input_size2)
    mlp2 = make_mlp(params2)
    x2 = jax.random.normal(k_x2, (batch2, input_size2), jnp.float32)
    out2 = jax.block_until_ready(mlp2(x2))
    ref2 = mlp_reference(x2, params2)
    assert out2.shape == (batch2, 1)
    assert jnp.allclose(out2, ref2, atol=1e-3, rtol=1e-3), float(
        jnp.max(jnp.abs(out2 - ref2)))

    # Batch not a multiple of 128 exercises the wrapper-side padding path.
    batch3 = 300
    x3 = jax.random.normal(k_x3, (batch3, input_size2), jnp.float32)
    out3 = jax.block_until_ready(mlp2(x3))
    ref3 = mlp_reference(x3, params2)
    assert out3.shape == (batch3, 1)
    assert jnp.allclose(out3, ref3, atol=1e-3, rtol=1e-3), float(
        jnp.max(jnp.abs(out3 - ref3)))

    print("KERNEL_OK")
</pallas_src>

<mosaic_0001>
module attributes {stable_mosaic.version = 11 : i64} {
  func.func @affine_kernel(%arg0: i32, %arg1: i32, %arg2: memref<128x128xf32, #tpu.memory_space<vmem>>, %arg3: memref<1x128xf32, #tpu.memory_space<vmem>>, %arg4: memref<1x1xf32, #tpu.memory_space<smem>>, %arg5: memref<1x128xf32, #tpu.memory_space<vmem>>, %arg6: memref<1x128xf32, #tpu.memory_space<vmem>>) attributes {dimension_semantics = [#tpu.dimension_semantics<parallel>, #tpu.dimension_semantics<arbitrary>], iteration_bounds = array<i64: 1, 1>, scalar_prefetch = 0 : i64, scratch_operands = 1 : i64, tpu.core_type = #tpu.core_type<tc>, window_params = [{transform_indices = @transform_0, window_bounds = array<i64: 128, 128>}, {transform_indices = @transform_1, window_bounds = array<i64: 1, 128>}, {transform_indices = @transform_2, window_bounds = array<i64: 1, 1>}, {transform_indices = @transform_3, window_bounds = array<i64: 1, 128>}]} {
    %c0_i32 = arith.constant 0 : i32
    %0 = arith.cmpi eq, %arg1, %c0_i32 : i32
    %1 = arith.extui %0 : i1 to i32
    %c0_i32_0 = arith.constant 0 : i32
    %2 = arith.cmpi ne, %1, %c0_i32_0 : i32
    scf.if %2 {
      %cst_10 = arith.constant 0.000000e+00 : f32
      %12 = vector.broadcast %cst_10 : f32 to vector<1x128xf32>
      %c0_11 = arith.constant 0 : index
      %c0_12 = arith.constant 0 : index
      %13 = vector.load %arg6[%c0_11, %c0_12] : memref<1x128xf32, #tpu.memory_space<vmem>>, vector<1x128xf32>
      tpu.vector_store %arg6[%c0_11, %c0_12], %12 {strides = array<i32>} : memref<1x128xf32, #tpu.memory_space<vmem>>, vector<1x128xf32>,
    } else {
    }
    %c0 = arith.constant 0 : index
    %c0_1 = arith.constant 0 : index
    %3 = vector.load %arg6[%c0, %c0_1] : memref<1x128xf32, #tpu.memory_space<vmem>>, vector<1x128xf32>
    %c0_2 = arith.constant 0 : index
    %c0_3 = arith.constant 0 : index
    %4 = vector.load %arg3[%c0_2, %c0_3] : memref<1x128xf32, #tpu.memory_space<vmem>>, vector<1x128xf32>
    %c0_4 = arith.constant 0 : index
    %c0_5 = arith.constant 0 : index
    %5 = vector.load %arg2[%c0_4, %c0_5] : memref<128x128xf32, #tpu.memory_space<vmem>>, vector<128x128xf32>
    %cst = arith.constant dense<0.000000e+00> : vector<1x128xf32>
    %6 = tpu.matmul %4, %5, %cst {dimension_numbers = #tpu.dot_dimension_numbers<[1], [1], [0], [0], [0, 0, 1, 0], [], []>, precision = #tpu.contract_precision<fp32>} : vector<1x128xf32>, vector<128x128xf32>, vector<1x128xf32> -> vector<1x128xf32>
    %7 = arith.addf %3, %6 : vector<1x128xf32>
    %c0_6 = arith.constant 0 : index
    %c0_7 = arith.constant 0 : index
    %8 = vector.load %arg6[%c0_6, %c0_7] : memref<1x128xf32, #tpu.memory_space<vmem>>, vector<1x128xf32>
    tpu.vector_store %arg6[%c0_6, %c0_7], %7 {strides = array<i32>} : memref<1x128xf32, #tpu.memory_space<vmem>>, vector<1x128xf32>,
    %c0_i32_8 = arith.constant 0 : i32
    %9 = arith.cmpi eq, %arg1, %c0_i32_8 : i32
    %10 = arith.extui %9 : i1 to i32
    %c0_i32_9 = arith.constant 0 : i32
    %11 = arith.cmpi ne, %10, %c0_i32_9 : i32
    scf.if %11 {
      %c0_10 = arith.constant 0 : index
      %c0_11 = arith.constant 0 : index
      %12 = vector.load %arg6[%c0_10, %c0_11] : memref<1x128xf32, #tpu.memory_space<vmem>>, vector<1x128xf32>
      %c0_12 = arith.constant 0 : index
      %c0_13 = arith.constant 0 : index
      %13 = memref.load %arg4[%c0_12, %c0_13] : memref<1x1xf32, #tpu.memory_space<smem>>
      %14 = vector.broadcast %13 : f32 to vector<1x128xf32>
      %15 = arith.addf %12, %14 : vector<1x128xf32>
      %c0_14 = arith.constant 0 : index
      %c0_15 = arith.constant 0 : index
      %16 = vector.load %arg5[%c0_14, %c0_15] : memref<1x128xf32, #tpu.memory_space<vmem>>, vector<1x128xf32>
      tpu.vector_store %arg5[%c0_14, %c0_15], %15 {strides = array<i32>} : memref<1x128xf32, #tpu.memory_space<vmem>>, vector<1x128xf32>,
    } else {
    }
    return
  }
  func.func @transform_0(%arg0: i32, %arg1: i32) -> (i32, i32) {
    %c0_i32 = arith.constant 0 : i32
    return %arg0, %arg1 : i32, i32
  }
  func.func @transform_1(%arg0: i32, %arg1: i32) -> (i32, i32) {
    %c0_i32 = arith.constant 0 : i32
    %c0_i32_0 = arith.constant 0 : i32
    return %c0_i32, %arg1 : i32, i32
  }
  func.func @transform_2(%arg0: i32, %arg1: i32) -> (i32, i32) {
    %c0_i32 = arith.constant 0 : i32
    %c0_i32_0 = arith.constant 0 : i32
    %c0_i32_1 = arith.constant 0 : i32
    return %c0_i32, %c0_i32_0 : i32, i32
  }
  func.func @transform_3(%arg0: i32, %arg1: i32) -> (i32, i32) {
    %c0_i32 = arith.constant 0 : i32
    %c0_i32_0 = arith.constant 0 : i32
    return %c0_i32, %arg0 : i32, i32
  }
}

</mosaic_0001>

<bundles_post_ra>
// kernel: forward.1
= control target key start
LH: loop header
LB: loop body
LE: loop exit
PB: predicated region body
PF: predicated region fallthrough
CT: control target
= control target key end

     0   :  { %v1152_v0 = vmov 0.0|0.0   ;;  %v1153_v4 = vmov 0.0   ;;  %vm1154_vm0 = vmmov 0   ;;  %s1452_s0 = inlined_call_operand.vmem [shape: f32[128,128], index: 0, kind: input, shape index: {}]   ;;  %s1453_s1 = inlined_call_operand.vmem [shape: f32[1,128], index: 1, kind: input, shape index: {}]   ;;  %s1454_s2 = inlined_call_operand.<no memory space> [shape: f32[1,1], index: 2, kind: input, shape index: {}]   ;;  %s1455_s3 = inlined_call_operand.vmem [shape: f32[1,128], index: 3, kind: output, shape index: {}]  }
   0x1   :  { %1005 = vmatprep.subr.bf16.mxu0 %v1152_v0  ;;  %v22_v1 = vld [vmem:[%s1452_s0] sm:$0xff]  ;;  %v23_v2 = vld [vmem:[%s1452_s0 + $0x8] sm:$0xff]  ;;  %1029 = vmatprep.subr.bf16.mxu1 %v1152_v0  ;;  %v24_v3 = vld [vmem:[%s1452_s0 + $0x10] sm:$0xff]  ;;  %19 = vst [vmem:[#allocation2] sm:$0x1] %v1153_v4 }
   0x2   :  { %v39_v5 = vand.u32 4294901760, %v22_v1  ;;  %v42_v6 = vand.u32 4294901760, %v23_v2  ;;  %v25_v7 = vld [vmem:[%s1452_s0 + $0x18] sm:$0xff]  ;;  %v45_v8 = vand.u32 4294901760, %v24_v3  ;;  %v26_v9 = vld [vmem:[%s1452_s0 + $0x20] sm:$0xff]  ;;  %v27_v10 = vld [vmem:[%s1452_s0 + $0x28] sm:$0xff]  ;;  %827 = vmatprep.mubr.msk.f32.mxu0 %vm1154_vm0, %v1153_v4  ;;  %862 = vmatprep.mubr.msk.f32.mxu1 %vm1154_vm0, %v1153_v4 }
   0x3   :  { %v48_v11 = vand.u32 4294901760, %v25_v7  ;;  %v51_v17 = vand.u32 4294901760, %v26_v9  ;;  %v54_v18 = vand.u32 4294901760, %v27_v10  ;;  %v28_v32 = vld [vmem:[%s1452_s0 + $0x30] sm:$0xff]  ;;  %v29_v33 = vld [vmem:[%s1452_s0 + $0x38] sm:$0xff]  ;;  %v30_v43 = vld [vmem:[%s1452_s0 + $0x40] sm:$0xff] }
   0x4   :  { %v1200_v12 = vpack.c.bf16 %v42_v6, %v39_v5  ;;  %v1202_v13 = vsub.f32 %v22_v1, %v39_v5  ;;  %v1204_v14 = vsub.f32 %v23_v2, %v42_v6  ;;  %v1206_v15 = vsub.f32 %v24_v3, %v45_v8  ;;  %v31_v48 = vld [vmem:[%s1452_s0 + $0x48] sm:$0xff]  ;;  %v32_v57 = vld [vmem:[%s1452_s0 + $0x50] sm:$0xff]  ;;  %v33_v58 = vld [vmem:[%s1452_s0 + $0x58] sm:$0xff] }
   0x5   :  { %v1208_v16 = vsub.f32 %v25_v7, %v48_v11  ;;  %v1218_v25 = vpack.c.bf16 %v48_v11, %v45_v8  ;;  %v1220_v26 = vsub.f32 %v26_v9, %v51_v17  ;;  %v1222_v27 = vsub.f32 %v27_v10, %v54_v18 }
   0x6   :  { %1007 = vmatpush3.bf16.xpose.msra.mxu0 %v1200_v12  ;;  %v132_v19 = vand.u32 4294901760, %v1202_v13  ;;  %v139_v20 = vand.u32 4294901760, %v1204_v14  ;;  %v146_v21 = vand.u32 4294901760, %v1206_v15  ;;  %v57_v35 = vand.u32 4294901760, %v28_v32 }
   0x7   :  { %1008 = vmatprep.subr.bf16.mxu0 %v1152_v0  ;;  %v153_v22 = vand.u32 4294901760, %v1208_v16  ;;  %v60_v36 = vand.u32 4294901760, %v29_v33  ;;  %v160_v39 = vand.u32 4294901760, %v1220_v26  ;;  %v167_v40 = vand.u32 4294901760, %v1222_v27 }
   0x8   :  { %v133_v23 = vsub.f32 %v1202_v13, %v132_v19  ;;  %v140_v24 = vsub.f32 %v1204_v14, %v139_v20  ;;  %v147_v30 = vsub.f32 %v1206_v15, %v146_v21  ;;  %v1237_v41 = vpack.c.bf16 %v54_v18, %v51_v17 }
   0x9   :  { %v154_v31 = vsub.f32 %v1208_v16, %v153_v22  ;;  %v1239_v42 = vsub.f32 %v28_v32, %v57_v35  ;;  %v1244_v45 = vsub.f32 %v29_v33, %v60_v36  ;;  %v161_v46 = vsub.f32 %v1220_v26, %v160_v39 }
   0xa   :  { %v134_v28 = vand.u32 4294901760, %v133_v23  ;;  %v141_v29 = vand.u32 4294901760, %v140_v24  ;;  %v148_v37 = vand.u32 4294901760, %v147_v30  ;;  %v168_v47 = vsub.f32 %v1222_v27, %v167_v40  ;;  %v34_v23 = vld [vmem:[%s1452_s0 + $0x60] sm:$0xff]  ;;  %v35_v24 = vld [vmem:[%s1452_s0 + $0x68] sm:$0xff] }
   0xb   :  { %v155_v38 = vand.u32 4294901760, %v154_v31  ;;  %v63_v49 = vand.u32 4294901760, %v30_v43  ;;  %v66_v50 = vand.u32 4294901760, %v31_v48  ;;  %v162_v51 = vand.u32 4294901760, %v161_v46 }
   0xc   :  { %v1030_v34 = vpack.c.bf16 %v141_v29, %v134_v28  ;;  %v169_v52 = vand.u32 4294901760, %v168_v47  ;;  %v174_v53 = vand.u32 4294901760, %v1239_v42  ;;  %v181_v54 = vand.u32 4294901760, %v1244_v45 }
   0xd   :  { %v1033_v44 = vpack.c.bf16 %v155_v38, %v148_v37  ;;  %v1256_v55 = vsub.f32 %v30_v43, %v63_v49  ;;  %v1258_v56 = vsub.f32 %v31_v48, %v66_v50  ;;  %v1266_v59 = vpack.c.bf16 %v60_v36, %v57_v35  ;;  %v36_v43 = vld [vmem:[%s1452_s0 + $0x70] sm:$0xff] }
   0xe   :  { %1010 = vmatpush3.bf16.xpose.msra.mxu0 %v1218_v25  ;;  %1031 = vmatpush3.bf16.xpose.msra.mxu1 %v1030_v34  ;;  %v1036_v60 = vpack.c.bf16 %v169_v52, %v162_v51  ;;  %v175_v61 = vsub.f32 %v1239_v42, %v174_v53  ;;  %v182_v62 = vsub.f32 %v1244_v45, %v181_v54  ;;  %v69_v63 = vand.u32 4294901760, %v32_v57  ;;  %v21_v52 = vld [vmem:[%s1453_s1] sm:$0x1] }
   0xf   :  { %1011 = vmatprep.subr.bf16.mxu0 %v1152_v0  ;;  %1032 = vmatprep.subr.bf16.mxu1 %v1152_v0  ;;  %v72_v1 = vand.u32 4294901760, %v33_v58  ;;  %v188_v2 = vand.u32 4294901760, %v1256_v55  ;;  %v195_v3 = vand.u32 4294901760, %v1258_v56  ;;  %v1272_v5 = vpack.c.bf16 %v139_v20, %v132_v19 }
  0x10   :  { %v1274_v6 = vpack.c.bf16 %v153_v22, %v146_v21  ;;  %v1276_v7 = vpack.c.bf16 %v167_v40, %v160_v39  ;;  %v176_v8 = vand.u32 4294901760, %v175_v61  ;;  %v183_v9 = vand.u32 4294901760, %v182_v62 }
  0x11   :  { %v1279_v10 = vpack.c.bf16 %v181_v54, %v174_v53  ;;  %v1283_v11 = vpack.c.bf16 %v195_v3, %v188_v2  ;;  %v1285_v17 = vsub.f32 %v32_v57, %v69_v63  ;;  %v1287_v18 = vsub.f32 %v33_v58, %v72_v1 }
  0x12   :  { %v1289_v19 = vpack.c.bf16 %v66_v50, %v63_v49  ;;  %v1039_v20 = vpack.c.bf16 %v183_v9, %v176_v8  ;;  %v189_v21 = vsub.f32 %v1256_v55, %v188_v2  ;;  %v196_v22 = vsub.f32 %v1258_v56, %v195_v3 }
  0x13   :  { %v75_v28 = vand.u32 4294901760, %v34_v23  ;;  %v78_v29 = vand.u32 4294901760, %v35_v24  ;;  %v202_v30 = vand.u32 4294901760, %v1285_v17  ;;  %v209_v31 = vand.u32 4294901760, %v1287_v18 }
  0x14   :  { %v190_v32 = vand.u32 4294901760, %v189_v21  ;;  %v197_v33 = vand.u32 4294901760, %v196_v22  ;;  %v1310_v37 = vpack.c.bf16 %v72_v1, %v69_v63  ;;  %v81_v46 = vand.u32 4294901760, %v36_v43 }
  0x15   :  { %v1304_v34 = vpack.c.bf16 %v209_v31, %v202_v30  ;;  %v1306_v35 = vsub.f32 %v34_v23, %v75_v28  ;;  %v1308_v36 = vsub.f32 %v35_v24, %v78_v29  ;;  %v203_v39 = vsub.f32 %v1285_v17, %v202_v30 }
  0x16   :  { %1013 = vmatpush3.bf16.xpose.msra.mxu0 %v1237_v41  ;;  %1034 = vmatpush3.bf16.xpose.msra.mxu1 %v1033_v44  ;;  %v1042_v38 = vpack.c.bf16 %v197_v33, %v190_v32  ;;  %v210_v40 = vsub.f32 %v1287_v18, %v209_v31  ;;  %v37_v44 = vld [vmem:[%s1452_s0 + $0x78] sm:$0xff]  ;;  %v1330_v54 = vsub.f32 %v36_v43, %v81_v46  ;;  %v1334_v58 = vand.u32 4294901760, %v21_v52 }
  0x17   :  { %1014 = vmatprep.subr.bf16.mxu0 %v1152_v0  ;;  %1035 = vmatprep.subr.bf16.mxu1 %v1152_v0  ;;  %v84_v47 = vand.u32 4294901760, %v37_v44  ;;  %v216_v48 = vand.u32 4294901760, %v1306_v35  ;;  %v223_v49 = vand.u32 4294901760, %v1308_v36  ;;  %v204_v50 = vand.u32 4294901760, %v203_v39 }
  0x18   :  { %v211_v51 = vand.u32 4294901760, %v210_v40  ;;  %v1341_v1 = vsub.f32 %v21_v52, %v1334_v58  ;;  %v230_v2 = vand.u32 4294901760, %v1330_v54  ;;  %v1057_v39 = vpack.c.bf16 %v1208_v16, %v1206_v15 }
  0x19   :  { %v1328_v53 = vpack.c.bf16 %v223_v49, %v216_v48  ;;  %v1332_v57 = vsub.f32 %v37_v44, %v84_v47  ;;  %v217_v62 = vsub.f32 %v1306_v35, %v216_v48  ;;  %v224_v63 = vsub.f32 %v1308_v36, %v223_v49 }
  0x1a   :  { %v1045_v61 = vpack.c.bf16 %v211_v51, %v204_v50  ;;  %v121_v21 = vand.u32 4294901760, %v1341_v1  ;;  %v1351_v22 = vpack.c.bf16 %v84_v47, %v81_v46  ;;  %v231_v24 = vsub.f32 %v1330_v54, %v230_v2 }
  0x1b   :  { %v237_v3 = vand.u32 4294901760, %v1332_v57  ;;  %v218_v8 = vand.u32 4294901760, %v217_v62  ;;  %v225_v9 = vand.u32 4294901760, %v224_v63  ;;  %v1066_v15 = vpack.c.bf16 %v1258_v56, %v1256_v55 }
  0x1c   :  { %v232_v30 = vand.u32 4294901760, %v231_v24  ;;  %v1069_v16 = vpack.c.bf16 %v1287_v18, %v1285_v17 }
  0x1d   :  { %v1048_v23 = vpack.c.bf16 %v225_v9, %v218_v8 }
  0x1e   :  { %1016 = vmatpush3.bf16.xpose.msra.mxu0 %v1266_v59  ;;  %1037 = vmatpush3.bf16.xpose.msra.mxu1 %v1036_v60  ;;  %v1336_v60 = vpack.c.bf16 %v78_v29, %v75_v28  ;;  %v238_v28 = vsub.f32 %v1332_v57, %v237_v3  ;;  %v122_v29 = vsub.f32 %v1341_v1, %v121_v21 }
  0x1f   :  { %1017 = vmatprep.subr.bf16.mxu0 %v1152_v0  ;;  %1038 = vmatprep.subr.bf16.mxu1 %v1152_v0 }
  0x20   :  { %v239_v31 = vand.u32 4294901760, %v238_v28  ;;  %v123_v32 = vand.u32 4294901760, %v122_v29 }
  0x22   :  { %v1051_v33 = vpack.c.bf16 %v239_v31, %v232_v30 }
  0x26   :  { %1019 = vmatpush3.bf16.xpose.msra.mxu0 %v1289_v19  ;;  %1040 = vmatpush3.bf16.xpose.msra.mxu1 %v1039_v20  ;;  %v1348_v20 = vpack.c.bf16 %v237_v3, %v230_v2 }
  0x27   :  { %1020 = vmatprep.subr.bf16.mxu0 %v1152_v0  ;;  %1041 = vmatprep.subr.bf16.mxu1 %v1152_v0 }
  0x2e   :  { %1022 = vmatpush3.bf16.xpose.msra.mxu0 %v1310_v37  ;;  %1043 = vmatpush3.bf16.xpose.msra.mxu1 %v1042_v38  ;;  %v1054_v38 = vpack.c.bf16 %v1204_v14, %v1202_v13  ;;  %v1060_v13 = vpack.c.bf16 %v1222_v27, %v1220_v26  ;;  %v1063_v14 = vpack.c.bf16 %v1244_v45, %v1239_v42 }
  0x2f   :  { %1023 = vmatprep.subr.bf16.mxu0 %v1152_v0  ;;  %1044 = vmatprep.subr.bf16.mxu1 %v1152_v0  ;;  %v1072_v26 = vpack.c.bf16 %v1308_v36, %v1306_v35  ;;  %v1075_v27 = vpack.c.bf16 %v1332_v57, %v1330_v54  ;;  %v686_v35 = vstv %s1454_s2 }
  0x36   :  { %1025 = vmatpush3.bf16.xpose.msra.mxu0 %v1336_v60  ;;  %1046 = vmatpush3.bf16.xpose.msra.mxu1 %v1045_v61 }
  0x37   :  { %1026 = vmatprep.subr.bf16.mxu0 %v1152_v0  ;;  %1047 = vmatprep.subr.bf16.mxu1 %v1152_v0 }
  0x3e   :  { %1028 = vmatpush3.bf16.xpose.msra.mxu0 %v1351_v22  ;;  %1049 = vmatpush3.bf16.xpose.msra.mxu1 %v1048_v23 }
  0x3f   :  { %1050 = vmatprep.subr.bf16.mxu1 %v1152_v0  ;;  %1053 = vmatprep.subr.bf16.mxu0 %v1152_v0 }
  0x45   :  { %828 = vmatmul.mubr.f32.vlgmr.msra.gmra.mrb[0].mxu0 %v123_v32 }
  0x46   :  { %1052 = vmatpush3.bf16.xpose.msra.mxu1 %v1051_v33  ;;  %1055 = vmatpush3.bf16.xpose.msra.mxu0 %v1054_v38 }
  0x47   :  { %1056 = vmatprep.subr.bf16.mxu0 %v1152_v0  ;;  %1077 = vmatprep.subr.bf16.mxu1 %v1152_v0 }
  0x48   :  { %897 = vmatprep.mubr.msk.f32.mxu0 %vm1154_vm0, %v1153_v4 }
  0x4d   :  { %863 = vmatmul.mubr.f32.vlgmr.msra.gmra.mrb[0].mxu1 %v1334_v58 }
  0x4e   :  { %1058 = vmatpush3.bf16.xpose.msra.mxu0 %v1057_v39  ;;  %1079 = vmatpush3.bf16.xpose.msra.mxu1 %v1200_v12 }
  0x4f   :  { %1059 = vmatprep.subr.bf16.mxu0 %v1152_v0  ;;  %1080 = vmatprep.subr.bf16.mxu1 %v1152_v0 }
  0x50   :  { %932 = vmatprep.mubr.msk.f32.mxu1 %vm1154_vm0, %v1153_v4 }
  0x56   :  { %1061 = vmatpush3.bf16.xpose.msra.mxu0 %v1060_v13  ;;  %1082 = vmatpush3.bf16.xpose.msra.mxu1 %v1218_v25 }
  0x57   :  { %1062 = vmatprep.subr.bf16.mxu0 %v1152_v0  ;;  %1083 = vmatprep.subr.bf16.mxu1 %v1152_v0 }
  0x5e   :  { %1064 = vmatpush3.bf16.xpose.msra.mxu0 %v1063_v14  ;;  %1085 = vmatpush3.bf16.xpose.msra.mxu1 %v1237_v41 }
  0x5f   :  { %1065 = vmatprep.subr.bf16.mxu0 %v1152_v0  ;;  %1086 = vmatprep.subr.bf16.mxu1 %v1152_v0 }
  0x66   :  { %1067 = vmatpush3.bf16.xpose.msra.mxu0 %v1066_v15  ;;  %1088 = vmatpush3.bf16.xpose.msra.mxu1 %v1266_v59 }
  0x67   :  { %1068 = vmatprep.subr.bf16.mxu0 %v1152_v0  ;;  %1089 = vmatprep.subr.bf16.mxu1 %v1152_v0 }
  0x6e   :  { %1070 = vmatpush3.bf16.xpose.msra.mxu0 %v1069_v16  ;;  %1091 = vmatpush3.bf16.xpose.msra.mxu1 %v1289_v19 }
  0x6f   :  { %1071 = vmatprep.subr.bf16.mxu0 %v1152_v0  ;;  %1092 = vmatprep.subr.bf16.mxu1 %v1152_v0 }
  0x76   :  { %1073 = vmatpush3.bf16.xpose.msra.mxu0 %v1072_v26  ;;  %1094 = vmatpush3.bf16.xpose.msra.mxu1 %v1310_v37 }
  0x77   :  { %1074 = vmatprep.subr.bf16.mxu0 %v1152_v0  ;;  %1095 = vmatprep.subr.bf16.mxu1 %v1152_v0 }
  0x7e   :  { %1076 = vmatpush3.bf16.xpose.msra.mxu0 %v1075_v27  ;;  %1097 = vmatpush3.bf16.xpose.msra.mxu1 %v1336_v60 }
  0x7f   :  { %1098 = vmatprep.subr.bf16.mxu1 %v1152_v0  ;;  %1101 = vmatprep.subr.bf16.mxu0 %v1152_v0 }
  0x85   :  { %898 = vmatmul.mubr.f32.vlgmr.msra.gmra.mrb[2].mxu0 %v1341_v1 }
  0x86   :  { %1100 = vmatpush3.bf16.xpose.msra.mxu1 %v1351_v22  ;;  %1103 = vmatpush3.bf16.xpose.msra.mxu0 %v1272_v5 }
  0x87   :  { %1104 = vmatprep.subr.bf16.mxu0 %v1152_v0  ;;  %1125 = vmatprep.subr.bf16.mxu1 %v1152_v0 }
  0x88   :  { %967 = vmatprep.mubr.msk.f32.mxu0 %vm1154_vm0, %v1153_v4 }
  0x8d   :  { %933 = vmatmul.mubr.f32.vlgmr.msra.gmra.mrb[2].mxu1 %v121_v21 }
  0x8e   :  { %1106 = vmatpush3.bf16.xpose.msra.mxu0 %v1274_v6  ;;  %1127 = vmatpush3.bf16.xpose.msra.mxu1 %v1200_v12 }
  0x8f   :  { %1107 = vmatprep.subr.bf16.mxu0 %v1152_v0  ;;  %1128 = vmatprep.subr.bf16.mxu1 %v1152_v0 }
  0x90   :  { %1002 = vmatprep.mubr.msk.f32.mxu1 %vm1154_vm0, %v1153_v4 }
  0x96   :  { %1109 = vmatpush3.bf16.xpose.msra.mxu0 %v1276_v7  ;;  %1130 = vmatpush3.bf16.xpose.msra.mxu1 %v1218_v25 }
  0x97   :  { %1110 = vmatprep.subr.bf16.mxu0 %v1152_v0  ;;  %1131 = vmatprep.subr.bf16.mxu1 %v1152_v0 }
  0x9e   :  { %1112 = vmatpush3.bf16.xpose.msra.mxu0 %v1279_v10  ;;  %1133 = vmatpush3.bf16.xpose.msra.mxu1 %v1237_v41 }
  0x9f   :  { %1113 = vmatprep.subr.bf16.mxu0 %v1152_v0  ;;  %1134 = vmatprep.subr.bf16.mxu1 %v1152_v0 }
  0xa6   :  { %1115 = vmatpush3.bf16.xpose.msra.mxu0 %v1283_v11  ;;  %1136 = vmatpush3.bf16.xpose.msra.mxu1 %v1266_v59  ;;  %v20_v11 = vld [vmem:[#allocation2] sm:$0x1] }
  0xa7   :  { %1116 = vmatprep.subr.bf16.mxu0 %v1152_v0  ;;  %1137 = vmatprep.subr.bf16.mxu1 %v1152_v0 }
  0xae   :  { %1118 = vmatpush3.bf16.xpose.msra.mxu0 %v1304_v34  ;;  %1139 = vmatpush3.bf16.xpose.msra.mxu1 %v1289_v19 }
  0xaf   :  { %1119 = vmatprep.subr.bf16.mxu0 %v1152_v0  ;;  %1140 = vmatprep.subr.bf16.mxu1 %v1152_v0 }
  0xb6   :  { %1121 = vmatpush3.bf16.xpose.msra.mxu0 %v1328_v53  ;;  %1142 = vmatpush3.bf16.xpose.msra.mxu1 %v1310_v37 }
  0xb7   :  { %1122 = vmatprep.subr.bf16.mxu0 %v1152_v0  ;;  %1143 = vmatprep.subr.bf16.mxu1 %v1152_v0 }
  0xbe   :  { %1124 = vmatpush3.bf16.xpose.msra.mxu0 %v1348_v20  ;;  %1145 = vmatpush3.bf16.xpose.msra.mxu1 %v1336_v60 }
  0xbf   :  { %1146 = vmatprep.subr.bf16.mxu1 %v1152_v0 }
  0xc5   :  { %968 = vmatmul.mubr.f32.vlgmr.msra.gmra.mrb[4].mxu0 %v1334_v58 }
  0xc6   :  { %1148 = vmatpush3.bf16.xpose.msra.mxu1 %v1351_v22 }
  0xcd   :  { %1003 = vmatmul.mubr.f32.vlgmr.msra.gmra.mrb[4].mxu1 %v1334_v58 }
 0x118   :  { %v125_v4 = vpop.f32.mrb[0].mxu0 }
 0x119   :  { %v829_v12 = vpop.f32.mrb[1].mxu0 }
 0x120   :  { %v276_v25 = vpop.f32.mrb[0].mxu1 }
 0x121   :  { %v277_v41 = vadd.f32 %v276_v25, %v125_v4  ;;  %v864_v42 = vpop.f32.mrb[1].mxu1 }
 0x158   :  { %v380_v45 = vpop.f32.mrb[2].mxu0 }
 0x159   :  { %v381_v55 = vadd.f32 %v380_v45, %v277_v41  ;;  %v899_v56 = vpop.f32.mrb[3].mxu0 }
 0x160   :  { %v469_v59 = vpop.f32.mrb[2].mxu1 }
 0x161   :  { %v470_v5 = vadd.f32 %v469_v59, %v381_v55  ;;  %v934_v6 = vpop.f32.mrb[3].mxu1 }
 0x198   :  { %v588_v7 = vpop.f32.mrb[4].mxu0 }
 0x199   :  { %v589_v10 = vadd.f32 %v588_v7, %v470_v5  ;;  %v969_v0 = vpop.f32.mrb[5].mxu0 }
 0x1a0   :  { %v675_v17 = vpop.f32.mrb[4].mxu1 }
 0x1a1   :  { %v676_v18 = vadd.f32 %v675_v17, %v589_v10  ;;  %v1004_v19 = vpop.f32.mrb[5].mxu1 }
 0x1a3   :  { %v679_v34 = vadd.f32 %v676_v18, %v20_v11 }
 0x1a5   :  { %680 = vst [vmem:[#allocation2] sm:$0x1] %v679_v34 }
 0x1ac   :  { %v684_v36 = vld [vmem:[#allocation2] sm:$0x1] }
 0x1ad   :  { %v687_v37 = vadd.f32 %v686_v35, %v684_v36 }
 0x1af   :  { %688 = vst [vmem:[%s1455_s3] sm:$0x1] %v687_v37 }

</bundles_post_ra>
